<compile_context>
chip_gen: v6e
topology: v6e:2x2x1
jax: 0.10.0
libtpu: 0.0.40
codegen_flags: <defaults>
</compile_context>

<pallas_src>
import functools

import jax
import jax.numpy as jnp
from jax.experimental import pallas as pl
from jax.experimental.pallas import tpu as pltpu

LANE = 128       # hidden feature axes zero-padded to the 128-lane width
SUBLANE = 8      # f32 sublane granularity for the batch-tile size
H1, H2 = 64, 32  # logical hidden widths of the DQN


def _round_up(n, m):
    return ((n + m - 1) // m) * m


def dqn_kernel(x_ref, w1_ref, b1_ref, w2_ref, b2_ref, w3_ref, b3_ref, o_ref):
    # fc1 + ReLU (bf16 operands, f32 accumulation on the MXU)
    x = x_ref[...].astype(jnp.bfloat16)
    h = jnp.dot(x, w1_ref[...], preferred_element_type=jnp.float32)
    h = jnp.maximum(h + b1_ref[...], 0.0)
    # fc2 + ReLU
    h = jnp.dot(h.astype(jnp.bfloat16), w2_ref[...],
                preferred_element_type=jnp.float32)
    h = jnp.maximum(h + b2_ref[...], 0.0)
    # fc3 + ReLU (the PyTorch module applies ReLU on the output layer too)
    h = jnp.dot(h.astype(jnp.bfloat16), w3_ref[...],
                preferred_element_type=jnp.float32)
    o_ref[...] = jnp.maximum(h + b3_ref[...], 0.0)


def dqn_forward(x, padded_params, tb_max=4096):
    """x: (B, s_dim) f32. padded_params: lane-padded params from pad_params()."""
    w1, b1, w2, b2, w3, b3 = padded_params
    B, s_dim = x.shape
    a_dim = w3.shape[1]

    # Batch tiling: tiles are multiples of 8 sublanes, final block may be
    # ragged (no wrapper-side batch padding / copies).  Split into >= 2 tiles
    # when possible so v7x's two TensorCores both get work.
    B8 = _round_up(B, SUBLANE)
    n_tiles = pl.cdiv(B8, tb_max)
    if n_tiles < 2 and B8 >= 2 * SUBLANE:
        n_tiles = 2
    tb = min(_round_up(pl.cdiv(B8, n_tiles), SUBLANE), B8)
    grid = (pl.cdiv(B8, tb),)

    resident = lambda a: pl.BlockSpec(a.shape, lambda i: (0, 0))

    return pl.pallas_call(
        dqn_kernel,
        out_shape=jax.ShapeDtypeStruct((B, a_dim), jnp.float32),
        grid=grid,
        in_specs=[
            pl.BlockSpec((tb, s_dim), lambda i: (i, 0)),  # x: tiled over batch
            resident(w1), resident(b1),                   # weights/biases are
            resident(w2), resident(b2),                   # VMEM-resident for
            resident(w3), resident(b3),                   # the whole grid
        ],
        out_specs=pl.BlockSpec((tb, a_dim), lambda i: (i, 0)),
        compiler_params=pltpu.CompilerParams(
            dimension_semantics=("parallel",)),
    )(x, w1, b1, w2, b2, w3, b3)


def init_params(key, s_dim, a_dim):
    """Mirrors the PyTorch module: xavier_uniform_ weights, default
    uniform(+-1/sqrt(fan_in)) biases.  Stored as (in, out) f32 at logical
    sizes so the kernel computes x @ W (== PyTorch x @ W.T + b)."""
    def xavier(k, fi, fo):
        bound = (6.0 / (fi + fo)) ** 0.5
        return jax.random.uniform(k, (fi, fo), jnp.float32, -bound, bound)

    def bias(k, fi, fo):
        bound = 1.0 / (fi ** 0.5)
        return jax.random.uniform(k, (1, fo), jnp.float32, -bound, bound)

    k = jax.random.split(key, 6)
    return (xavier(k[0], s_dim, H1), bias(k[1], s_dim, H1),
            xavier(k[2], H1, H2),    bias(k[3], H1, H2),
            xavier(k[4], H2, a_dim), bias(k[5], H2, a_dim))


def pad_params(params):
    """Zero-pad only the hidden feature axes to the 128-lane width:
    w1 (s_dim,128) bf16, w2 (128,128) bf16, w3 (128,a_dim) bf16,
    b1/b2 (1,128) f32, b3 (1,a_dim) f32.  Padding is exact: padded
    weight/bias lanes are zero, so padded hidden lanes stay 0 through ReLU."""
    w1, b1, w2, b2, w3, b3 = params
    s_dim, a_dim = w1.shape[0], w3.shape[1]
    w1p = jnp.zeros((s_dim, LANE), jnp.bfloat16).at[:, :H1].set(
        w1.astype(jnp.bfloat16))
    b1p = jnp.zeros((1, LANE), jnp.float32).at[:, :H1].set(b1)
    w2p = jnp.zeros((LANE, LANE), jnp.bfloat16).at[:H1, :H2].set(
        w2.astype(jnp.bfloat16))
    b2p = jnp.zeros((1, LANE), jnp.float32).at[:, :H2].set(b2)
    w3p = jnp.zeros((LANE, a_dim), jnp.bfloat16).at[:H2, :].set(
        w3.astype(jnp.bfloat16))
    b3p = b3.astype(jnp.float32)
    return (w1p, b1p, w2p, b2p, w3p, b3p)


def dqn_reference(x, params):
    """Pure-JAX f32 reference of the PyTorch forward."""
    w1, b1, w2, b2, w3, b3 = params
    h = jnp.maximum(x @ w1 + b1, 0.0)
    h = jnp.maximum(h @ w2 + b2, 0.0)
    h = jnp.maximum(h @ w3 + b3, 0.0)
    return h.reshape(h.shape[0], -1)


if __name__ == "__main__":
    S_DIM, A_DIM = 16, 8

    key = jax.random.PRNGKey(0)
    kx1, kx2, kp = jax.random.split(key, 3)

    params = init_params(kp, S_DIM, A_DIM)   # logical f32 params (reference)
    padded = pad_params(params)              # lane-padded bf16 params (kernel)

    # Small batch: single grid step.
    x1 = jax.random.normal(kx1, (4, S_DIM), dtype=jnp.float32)
    fwd = jax.jit(dqn_forward)
    out1 = jax.block_until_ready(fwd(x1, padded))
    ref1 = dqn_reference(x1, params)
    assert out1.shape == (4, A_DIM), out1.shape
    assert jnp.allclose(out1, ref1, atol=5e-2, rtol=5e-2), "mismatch (B=4)"

    # Ragged batch: multi-step grid with a partial final block.
    x2 = jax.random.normal(kx2, (40, S_DIM), dtype=jnp.float32)
    fwd_small_tiles = jax.jit(functools.partial(dqn_forward, tb_max=16))
    out2 = jax.block_until_ready(fwd_small_tiles(x2, padded))
    ref2 = dqn_reference(x2, params)
    assert out2.shape == (40, A_DIM), out2.shape
    assert jnp.allclose(out2, ref2, atol=5e-2, rtol=5e-2), "mismatch (B=40)"

    print("KERNEL_OK")
</pallas_src>

<mosaic_0001>
module attributes {stable_mosaic.version = 11 : i64} {
  func.func @dqn_kernel(%arg0: i32, %arg1: memref<8x16xf32, #tpu.memory_space<vmem>>, %arg2: memref<16x128xbf16, #tpu.memory_space<vmem>>, %arg3: memref<1x128xf32, #tpu.memory_space<vmem>>, %arg4: memref<128x128xbf16, #tpu.memory_space<vmem>>, %arg5: memref<1x128xf32, #tpu.memory_space<vmem>>, %arg6: memref<128x8xbf16, #tpu.memory_space<vmem>>, %arg7: memref<1x8xf32, #tpu.memory_space<vmem>>, %arg8: memref<8x8xf32, #tpu.memory_space<vmem>>) attributes {dimension_semantics = [#tpu.dimension_semantics<parallel>], iteration_bounds = array<i64: 1>, scalar_prefetch = 0 : i64, scratch_operands = 0 : i64, tpu.core_type = #tpu.core_type<tc>, window_params = [{transform_indices = @transform_0, window_bounds = array<i64: 8, 16>}, {pipeline_mode = #tpu.pipeline_mode<synchronous>, transform_indices = @transform_1, window_bounds = array<i64: 16, 128>}, {pipeline_mode = #tpu.pipeline_mode<synchronous>, transform_indices = @transform_2, window_bounds = array<i64: 1, 128>}, {pipeline_mode = #tpu.pipeline_mode<synchronous>, transform_indices = @transform_3, window_bounds = array<i64: 128, 128>}, {pipeline_mode = #tpu.pipeline_mode<synchronous>, transform_indices = @transform_4, window_bounds = array<i64: 1, 128>}, {pipeline_mode = #tpu.pipeline_mode<synchronous>, transform_indices = @transform_5, window_bounds = array<i64: 128, 8>}, {pipeline_mode = #tpu.pipeline_mode<synchronous>, transform_indices = @transform_6, window_bounds = array<i64: 1, 8>}, {transform_indices = @transform_7, window_bounds = array<i64: 8, 8>}]} {
    %c0 = arith.constant 0 : index
    %c0_0 = arith.constant 0 : index
    %0 = vector.load %arg1[%c0, %c0_0] : memref<8x16xf32, #tpu.memory_space<vmem>>, vector<8x16xf32>
    %1 = arith.truncf %0 : vector<8x16xf32> to vector<8x16xbf16>
    %c0_1 = arith.constant 0 : index
    %c0_2 = arith.constant 0 : index
    %2 = vector.load %arg2[%c0_1, %c0_2] : memref<16x128xbf16, #tpu.memory_space<vmem>>, vector<16x128xbf16>
    %cst = arith.constant dense<0.000000e+00> : vector<8x128xf32>
    %3 = tpu.matmul %1, %2, %cst {dimension_numbers = #tpu.dot_dimension_numbers<[1], [0], [0], [1], [0, 0, 1, 1], [], []>} : vector<8x16xbf16>, vector<16x128xbf16>, vector<8x128xf32> -> vector<8x128xf32>
    %c0_3 = arith.constant 0 : index
    %c0_4 = arith.constant 0 : index
    %4 = vector.load %arg3[%c0_3, %c0_4] : memref<1x128xf32, #tpu.memory_space<vmem>>, vector<1x128xf32>
    %5 = vector.broadcast %4 : vector<1x128xf32> to vector<8x128xf32>
    %6 = arith.addf %3, %5 : vector<8x128xf32>
    %cst_5 = arith.constant 0.000000e+00 : f32
    %7 = vector.broadcast %cst_5 : f32 to vector<8x128xf32>
    %8 = arith.maximumf %6, %7 : vector<8x128xf32>
    %9 = arith.truncf %8 : vector<8x128xf32> to vector<8x128xbf16>
    %c0_6 = arith.constant 0 : index
    %c0_7 = arith.constant 0 : index
    %10 = vector.load %arg4[%c0_6, %c0_7] : memref<128x128xbf16, #tpu.memory_space<vmem>>, vector<128x128xbf16>
    %cst_8 = arith.constant dense<0.000000e+00> : vector<8x128xf32>
    %11 = tpu.matmul %9, %10, %cst_8 {dimension_numbers = #tpu.dot_dimension_numbers<[1], [0], [0], [1], [0, 0, 1, 1], [], []>} : vector<8x128xbf16>, vector<128x128xbf16>, vector<8x128xf32> -> vector<8x128xf32>
    %c0_9 = arith.constant 0 : index
    %c0_10 = arith.constant 0 : index
    %12 = vector.load %arg5[%c0_9, %c0_10] : memref<1x128xf32, #tpu.memory_space<vmem>>, vector<1x128xf32>
    %13 = vector.broadcast %12 : vector<1x128xf32> to vector<8x128xf32>
    %14 = arith.addf %11, %13 : vector<8x128xf32>
    %cst_11 = arith.constant 0.000000e+00 : f32
    %15 = vector.broadcast %cst_11 : f32 to vector<8x128xf32>
    %16 = arith.maximumf %14, %15 : vector<8x128xf32>
    %17 = arith.truncf %16 : vector<8x128xf32> to vector<8x128xbf16>
    %c0_12 = arith.constant 0 : index
    %c0_13 = arith.constant 0 : index
    %18 = vector.load %arg6[%c0_12, %c0_13] : memref<128x8xbf16, #tpu.memory_space<vmem>>, vector<128x8xbf16>
    %cst_14 = arith.constant dense<0.000000e+00> : vector<8x8xf32>
    %19 = tpu.matmul %17, %18, %cst_14 {dimension_numbers = #tpu.dot_dimension_numbers<[1], [0], [0], [1], [0, 0, 1, 1], [], []>} : vector<8x128xbf16>, vector<128x8xbf16>, vector<8x8xf32> -> vector<8x8xf32>
    %c0_15 = arith.constant 0 : index
    %c0_16 = arith.constant 0 : index
    %20 = vector.load %arg7[%c0_15, %c0_16] : memref<1x8xf32, #tpu.memory_space<vmem>>, vector<1x8xf32>
    %21 = vector.broadcast %20 : vector<1x8xf32> to vector<8x8xf32>
    %22 = arith.addf %19, %21 : vector<8x8xf32>
    %cst_17 = arith.constant 0.000000e+00 : f32
    %23 = vector.broadcast %cst_17 : f32 to vector<8x8xf32>
    %24 = arith.maximumf %22, %23 : vector<8x8xf32>
    %c0_18 = arith.constant 0 : index
    %c0_19 = arith.constant 0 : index
    %25 = vector.load %arg8[%c0_18, %c0_19] : memref<8x8xf32, #tpu.memory_space<vmem>>, vector<8x8xf32>
    tpu.vector_store %arg8[%c0_18, %c0_19], %24 {strides = array<i32>} : memref<8x8xf32, #tpu.memory_space<vmem>>, vector<8x8xf32>,
    return
  }
  func.func @transform_0(%arg0: i32) -> (i32, i32) {
    %c0_i32 = arith.constant 0 : i32
    %c0_i32_0 = arith.constant 0 : i32
    return %arg0, %c0_i32 : i32, i32
  }
  func.func @transform_1(%arg0: i32) -> (i32, i32) {
    %c0_i32 = arith.constant 0 : i32
    %c0_i32_0 = arith.constant 0 : i32
    %c0_i32_1 = arith.constant 0 : i32
    return %c0_i32, %c0_i32_0 : i32, i32
  }
  func.func @transform_2(%arg0: i32) -> (i32, i32) {
    %c0_i32 = arith.constant 0 : i32
    %c0_i32_0 = arith.constant 0 : i32
    %c0_i32_1 = arith.constant 0 : i32
    return %c0_i32, %c0_i32_0 : i32, i32
  }
  func.func @transform_3(%arg0: i32) -> (i32, i32) {
    %c0_i32 = arith.constant 0 : i32
    %c0_i32_0 = arith.constant 0 : i32
    %c0_i32_1 = arith.constant 0 : i32
    return %c0_i32, %c0_i32_0 : i32, i32
  }
  func.func @transform_4(%arg0: i32) -> (i32, i32) {
    %c0_i32 = arith.constant 0 : i32
    %c0_i32_0 = arith.constant 0 : i32
    %c0_i32_1 = arith.constant 0 : i32
    return %c0_i32, %c0_i32_0 : i32, i32
  }
  func.func @transform_5(%arg0: i32) -> (i32, i32) {
    %c0_i32 = arith.constant 0 : i32
    %c0_i32_0 = arith.constant 0 : i32
    %c0_i32_1 = arith.constant 0 : i32
    return %c0_i32, %c0_i32_0 : i32, i32
  }
  func.func @transform_6(%arg0: i32) -> (i32, i32) {
    %c0_i32 = arith.constant 0 : i32
    %c0_i32_0 = arith.constant 0 : i32
    %c0_i32_1 = arith.constant 0 : i32
    return %c0_i32, %c0_i32_0 : i32, i32
  }
  func.func @transform_7(%arg0: i32) -> (i32, i32) {
    %c0_i32 = arith.constant 0 : i32
    %c0_i32_0 = arith.constant 0 : i32
    return %arg0, %c0_i32 : i32, i32
  }
}

</mosaic_0001>

<bundles_post_ra>
// kernel: dqn_forward.1
= control target key start
LH: loop header
LB: loop body
LE: loop exit
PB: predicated region body
PF: predicated region fallthrough
CT: control target
= control target key end

     0   :  { %12 = vsyncpa [#allocation3], 0  ;;  %s678_s0 = inlined_call_operand.hbm [shape: f32[4,16], index: 0, kind: input, shape index: {}]   ;;  %s679_s1 = inlined_call_operand.vmem [shape: bf16[16,128], index: 1, kind: input, shape index: {}]   ;;  %s680_s2 = inlined_call_operand.vmem [shape: f32[1,128], index: 2, kind: input, shape index: {}]   ;;  %s681_s3 = inlined_call_operand.vmem [shape: bf16[128,128], index: 3, kind: input, shape index: {}]   ;;  %s682_s4 = inlined_call_operand.hbm [shape: f32[1,128], index: 4, kind: input, shape index: {}]   ;;  %s683_s5 = inlined_call_operand.vmem [shape: bf16[128,8], index: 5, kind: input, shape index: {}]   ;;  %s684_s6 = inlined_call_operand.vmem [shape: f32[1,8], index: 6, kind: input, shape index: {}]   ;;  %s685_s7 = inlined_call_operand.hbm [shape: f32[4,8], index: 7, kind: output, shape index: {}]  }
   0x1   :  { %13 = vsyncpa [#allocation6], 0 }
   0x2   :  { %14 = vsyncpa [#allocation4], 0 }
   0x3   :  { %19 = vsyncadd [#allocation3], 64  ;;  %s539_s24 = smov [#allocation2]  }
   0x4   :  { %s20_s25 = sshll.u32 %s539_s24, 4  ;;  %s21_s25 = int_to_ptr.vmem [resolvable:$true] %s20_s25 }
   0x5   :  { %s481_s26 = scalar_lea.vmem %s21_s25, 64  ;;  %s485_s27 = scalar_lea.vmem %s21_s25, 128 }
   0x6   :  { %p482_p0 = scmp.ne.s32.totalorder %s21_s25, %s481_s26  ;;  %p486_p1 = scmp.lt.s32.totalorder %s21_s25, %s21_s25 }
   0x7   :  { %p487_p2 = scmp.lt.s32.totalorder %s485_s27, %s481_s26 }
   0x9   :  { %p488_p3 = por %p487_p2, %p486_p1 }
   0xb   :  { %p489_p4 = pnand %p488_p3, %p482_p0 }
   0xd   :  { %492 = shalt.err (!%p489_p4)
}
   0xe   :  { %s540_s28 = smov 64   ;;  %s541_s29 = smov 4  }
   0xf   :  { %26 = dma.hbm_to_vmem [thread:$0]  %s678_s0, 64, %s21_s25, [#allocation3], %s540_s28, %s540_s28, %s541_s29  }
  0x10   :  { %s542_s9 = smov [#allocation5]  }
  0x11   :  { %s39_s10 = sshll.u32 %s542_s9, 4  ;;  %s40_s10 = int_to_ptr.vmem [resolvable:$true] %s39_s10 }
  0x12   :  { %s501_s11 = scalar_lea.vmem %s40_s10, 16  ;;  %s505_s12 = scalar_lea.vmem %s40_s10, 32 }
  0x13   :  { %p502_p5 = scmp.ne.s32.totalorder %s40_s10, %s501_s11  ;;  %p506_p6 = scmp.lt.s32.totalorder %s40_s10, %s40_s10 }
  0x14   :  { %p507_p7 = scmp.lt.s32.totalorder %s505_s12, %s501_s11 }
  0x16   :  { %p508_p8 = por %p507_p7, %p506_p6 }
  0x18   :  { %p509_p9 = pnand %p508_p8, %p502_p5 }
  0x1a   :  { %512 = shalt.err (!%p509_p9)
}
  0x1b   :  { %42 = dma.hbm_to_vmem [thread:$0]  %s682_s4, 16, %s40_s10, [#allocation6]  }
  0x1c   :  { %533 = dma.done.wait [#allocation3], 128  }
  0x1d   :  { %534 = vsyncadd [#allocation3], 4294967168 }
  0x1e   :  { %535 = dma.done.wait [#allocation6], 16  }
  0x1f   :  { %536 = vsyncadd [#allocation6], 4294967280  ;;  %v543_v0 = vmov 0.0   ;;  %vm544_vm0 = vmmov 0   ;;  %v456_v1 = vld [vmem:[%s679_s1] sm:$0xff]   ;;  %vm71_vm1 = vcmask 130048  }
  0x20   :  { %403 = vmatprep.subr.bf16.mxu0 %v543_v0  ;;  %405 = vmatprep.mubr.msk.bf16.mxu0 %vm544_vm0, %v543_v0  ;;  %v54_v2 = vld [vmem:[#allocation2] sm:$0xff]  ;;  %v457_v4 = vld [vmem:[%s681_s3 + $0x38] sm:$0xff]   ;;  %v458_v5 = vld [vmem:[%s681_s3 + $0x30] sm:$0xff]   ;;  %vm342_vm2 = vcmask 64512  }
  0x21   :  { %409 = vmatprep.subr.bf16.mxu1 %v543_v0  ;;  %425 = vmatprep.mubr.msk.bf16.mxu1 %vm544_vm0, %v543_v0  ;;  %v55_v3 = vpack.c.bf16 %v54_v2, %v54_v2  ;;  %v459_v6 = vld [vmem:[%s681_s3 + $0x28] sm:$0xff]   ;;  %v460_v7 = vld [vmem:[%s681_s3 + $0x20] sm:$0xff]   ;;  %v461_v8 = vld [vmem:[%s681_s3 + $0x18] sm:$0xff]  }
  0x22   :  { %404 = vmatpush3.bf16.msra.mxu0 %v456_v1  ;;  %410 = vmatpush3.bf16.msra.mxu1 %v457_v4  ;;  %v462_v9 = vld [vmem:[%s681_s3 + $0x10] sm:$0xff]   ;;  %v463_v10 = vld [vmem:[%s681_s3 + $0x8] sm:$0xff]   ;;  %v464_v11 = vld [vmem:[%s681_s3] sm:$0xff]  }
  0x23   :  { %429 = vmatprep.subr.bf16.mxu0 %v543_v0  ;;  %411 = vmatprep.subr.bf16.mxu1 %v543_v0  ;;  %v465_v12 = vld [vmem:[%s683_s5 + $0x38] sm:$0xff]   ;;  %v466_v13 = vld [vmem:[%s683_s5 + $0x30] sm:$0xff]   ;;  %v467_v14 = vld [vmem:[%s683_s5 + $0x28] sm:$0xff]  }
  0x24   :  { %v468_v15 = vld [vmem:[%s683_s5 + $0x20] sm:$0xff]   ;;  %v469_v16 = vld [vmem:[%s683_s5 + $0x18] sm:$0xff]   ;;  %v470_v17 = vld [vmem:[%s683_s5 + $0x10] sm:$0xff]  }
  0x25   :  { %406 = vmatmul.mubr.msk.bf16.vlgmr.msra.gmra.mxu0 %vm71_vm1, %v55_v3  ;;  %v362_v18 = vld [vmem:[%s680_s2] ss:$0 sm:$0xff]  ;;  %v471_v26 = vld [vmem:[%s683_s5 + $0x8] sm:$0xff]  }
  0x26   :  { %445 = vmatprep.mubr.msk.bf16.mxu0 %vm544_vm0, %v543_v0  ;;  %412 = vmatpush3.bf16.msra.mxu1 %v458_v5  ;;  %v472_v27 = vld [vmem:[%s683_s5] sm:$0xff]   ;;  %v365_v28 = vld [vmem:[#allocation5] ss:$0 sm:$0xff] }
  0x27   :  { %413 = vmatprep.subr.bf16.mxu1 %v543_v0  ;;  %430 = vmatpush3.bf16.msra.mxu0 %v465_v12  ;;  %v374_v36 = vld [vmem:[%s684_s6] ss:$0 sm:$0xff] }
  0x28   :  { %431 = vmatprep.subr.bf16.mxu0 %v543_v0 }
  0x2a   :  { %414 = vmatpush3.bf16.msra.mxu1 %v459_v6 }
  0x2b   :  { %415 = vmatprep.subr.bf16.mxu1 %v543_v0  ;;  %432 = vmatpush3.bf16.msra.mxu0 %v466_v13 }
  0x2c   :  { %433 = vmatprep.subr.bf16.mxu0 %v543_v0 }
  0x2e   :  { %416 = vmatpush3.bf16.msra.mxu1 %v460_v7 }
  0x2f   :  { %417 = vmatprep.subr.bf16.mxu1 %v543_v0  ;;  %434 = vmatpush3.bf16.msra.mxu0 %v467_v14 }
  0x30   :  { %435 = vmatprep.subr.bf16.mxu0 %v543_v0 }
  0x32   :  { %418 = vmatpush3.bf16.msra.mxu1 %v461_v8 }
  0x33   :  { %419 = vmatprep.subr.bf16.mxu1 %v543_v0  ;;  %436 = vmatpush3.bf16.msra.mxu0 %v468_v15 }
  0x34   :  { %437 = vmatprep.subr.bf16.mxu0 %v543_v0 }
  0x36   :  { %420 = vmatpush3.bf16.msra.mxu1 %v462_v9 }
  0x37   :  { %421 = vmatprep.subr.bf16.mxu1 %v543_v0  ;;  %438 = vmatpush3.bf16.msra.mxu0 %v469_v16 }
  0x38   :  { %439 = vmatprep.subr.bf16.mxu0 %v543_v0 }
  0x3a   :  { %422 = vmatpush3.bf16.msra.mxu1 %v463_v10 }
  0x3b   :  { %423 = vmatprep.subr.bf16.mxu1 %v543_v0  ;;  %440 = vmatpush3.bf16.msra.mxu0 %v470_v17 }
  0x3c   :  { %441 = vmatprep.subr.bf16.mxu0 %v543_v0 }
  0x3e   :  { %424 = vmatpush3.bf16.msra.mxu1 %v464_v11 }
  0x3f   :  { %442 = vmatpush3.bf16.msra.mxu0 %v471_v26 }
  0x40   :  { %443 = vmatprep.subr.bf16.mxu0 %v543_v0 }
  0x43   :  { %444 = vmatpush3.bf16.msra.mxu0 %v472_v27 }
  0xe5   :  { %v109_v19 = vpop.f32.mrf.mxu0 }
  0xe6   :  { %v110_v20 = vadd.f32 %v362_v18, %v109_v19 }
  0xe7   :  { %v407_v21 = vpop.f32.mrf.mxu0 }
  0xe8   :  { %v115_v22 = vmax.f32 %v110_v20, 0.0 }
  0xe9   :  { %v112_v23 = vpop.f32.mrf.mxu0 }
  0xea   :  { %v116_v24 = vpack.c.bf16 %v115_v22, %v115_v22 }
  0xeb   :  { %v408_v25 = vpop.f32.mrf.mxu0 }
  0xec   :  { %426 = vmatmul.mubr.bf16.vlgmr.msra.gmra.mxu1 %v116_v24 }
 0x1ac   :  { %v222_v29 = vpop.f32.mrf.mxu1 }
 0x1ad   :  { %v223_v30 = vadd.f32 %v365_v28, %v222_v29 }
 0x1ae   :  { %v427_v31 = vpop.f32.mrf.mxu1 }
 0x1af   :  { %v228_v32 = vmax.f32 %v223_v30, 0.0 }
 0x1b0   :  { %v225_v33 = vpop.f32.mrf.mxu1 }
 0x1b1   :  { %v229_v34 = vpack.c.bf16 %v228_v32, %v228_v32 }
 0x1b2   :  { %v428_v35 = vpop.f32.mrf.mxu1 }
 0x1b3   :  { %446 = vmatmul.mubr.bf16.vlgmr.msra.gmra.mxu0 %v229_v34 }
 0x273   :  { %v335_v37 = vpop.f32.mrf.mxu0 }
 0x274   :  { %v336_v38 = vadd.f32 %v374_v36, %v335_v37 }
 0x275   :  { %v447_v39 = vpop.f32.mrf.mxu0 }
 0x276   :  { %v341_v40 = vmax.f32 %v336_v38, 0.0 }
 0x277   :  { %v338_v41 = vpop.f32.mrf.mxu0 }
 0x278   :  { %343 = vst.msk [vmem:[#allocation7] sm:$0xff] %vm342_vm2, %v341_v40 }
 0x279   :  { %v448_v42 = vpop.f32.mrf.mxu0 }
 0x27a   :  { %348 = vsyncadd [#allocation4], 64  ;;  %s545_s5 = smov [#allocation7]  }
 0x27b   :  { %s349_s24 = sshll.u32 %s545_s5, 4  ;;  %s350_s24 = int_to_ptr.vmem [resolvable:$true] %s349_s24 }
 0x27c   :  { %s513_s25 = scalar_lea.vmem %s350_s24, 64  ;;  %s517_s26 = scalar_lea.vmem %s350_s24, 128 }
 0x27d   :  { %p514_p10 = scmp.ne.s32.totalorder %s350_s24, %s513_s25  ;;  %p518_p11 = scmp.lt.s32.totalorder %s350_s24, %s350_s24 }
 0x27e   :  { %p519_p12 = scmp.lt.s32.totalorder %s517_s26, %s513_s25 }
 0x280   :  { %p520_p13 = por %p519_p12, %p518_p11 }
 0x282   :  { %p521_p0 = pnand %p520_p13, %p514_p10 }
 0x284   :  { %524 = shalt.err (!%p521_p0)
}
 0x285   :  { %355 = dma.vmem_to_hbm [thread:$0]  %s350_s24, 64, %s685_s7, [#allocation4], %s540_s28, %s540_s28, %s541_s29  }
 0x286   :  { %537 = dma.done.wait [#allocation4], 128  }
 0x287   :  { %538 = vsyncadd [#allocation4], 4294967168 }
 0x288   :  { %359 = vsyncpa [#allocation3], 1 }
 0x289   :  { %360 = vsyncpa [#allocation6], 1 }
 0x28a   :  { %361 = vsyncpa [#allocation4], 1 }

</bundles_post_ra>
